<compile_context>
chip_gen: v7x
topology: tpu7x:2x2x1
jax: 0.10.0
libtpu: 0.0.40
codegen_flags: <defaults>
</compile_context>

<pallas_src>
import numpy as np

import jax
import jax.numpy as jnp
from jax.experimental import pallas as pl
from jax.experimental.pallas import tpu as pltpu


# ---------------------------------------------------------------------------
# Fixed LeNet / CIFAR geometry (fc1 hard-codes 16*5*5 -> 32x32 inputs).
# ---------------------------------------------------------------------------
IMG = 32                  # input height == width
K = 5                     # conv kernel size
C1, C2 = 6, 16            # conv1 / conv2 output channels
H1 = IMG - K + 1          # 28 : conv1 output H/W
P1 = H1 // 2              # 14 : pool1 output H/W
H2 = P1 - K + 1           # 10 : conv2 output H/W
P2 = H2 // 2              # 5  : pool2 output H/W
FC1, FC2 = 120, 84
LANE = 128                # all matmul operands are 128 / 256 lanes wide

_ROLL_UP_SIGN = None      # resolved once by _detect_roll_sign()


def _round_up(x, m):
    return (x + m - 1) // m * m


def _detect_roll_sign():
    """Probe pltpu.roll's direction convention once (outside any jit trace).

    The kernel needs "shift up by k": out[r] = x[r + k].  Under jnp.roll
    semantics that is shift = -k; probing makes the kernel correct under
    either convention.  Defaults to the jnp.roll convention if never called.
    """
    global _ROLL_UP_SIGN
    if _ROLL_UP_SIGN is not None:
        return _ROLL_UP_SIGN

    def kernel(x_ref, o_ref):
        o_ref[...] = pltpu.roll(x_ref[...], 1, 0)

    x = jnp.tile(jnp.arange(8, dtype=jnp.float32)[:, None], (1, LANE))
    r = pl.pallas_call(
        kernel, out_shape=jax.ShapeDtypeStruct((8, LANE), jnp.float32))(x)
    _ROLL_UP_SIGN = -1 if float(r[1, 0]) < 0.5 else 1
    return _ROLL_UP_SIGN


def _shift_up(x, k, axis):
    """out[..., i, ...] = x[..., (i + k) % size, ...] via an XLU rotate."""
    if k == 0:
        return x
    sign = _ROLL_UP_SIGN if _ROLL_UP_SIGN is not None else -1
    return pltpu.roll(x, (sign * k) % x.shape[axis], axis)


# ---------------------------------------------------------------------------
# The fused kernel: conv1+pool -> conv2+pool -> fc1 -> fc2 -> fc3 in VMEM.
#
# Row/lane bookkeeping (everything derived from the raw row-major image rows):
#   input lane           = w*cin + ci                 at row slot h
#   conv1 output lane    = j*6  + co   (j  < 28)      at row slot i
#   pool1 value          = lane 12*b  + c              at row slot 2*a
#   conv2 output lane    = j2*16 + co2 (j2 < 10)      at row slot 2*i2
#   pool2 value          = lane 32*b2 + c2             at row slot 4*a2
# Unused rows/lanes of every band matrix are zero, so garbage slots never
# contribute downstream.
# ---------------------------------------------------------------------------
def _lenet_kernel(x_ref, b1m_ref, b1v_ref, b2m_ref, b2v_ref, f1m_ref, f1v_ref,
                  w2_ref, v2_ref, w3_ref, v3_ref, o_ref):
    nb = x_ref.shape[0]
    rows = nb * IMG

    # Raw image rows: row r = n*32 + h holds pixels (w, ci) flattened in lanes.
    x = x_ref[...].reshape(rows, LANE)                       # float32

    # ---- conv1 + bias + ReLU: 5 band matmuls, one per kernel row kh --------
    acc = jnp.dot(x.astype(jnp.bfloat16), b1m_ref[0],
                  preferred_element_type=jnp.float32)
    for kh in range(1, K):
        lhs = _shift_up(x, kh, 0).astype(jnp.bfloat16)
        acc = acc + jnp.dot(lhs, b1m_ref[kh],
                            preferred_element_type=jnp.float32)
    y = jnp.maximum(acc + b1v_ref[...], 0.0)
    # ---- 2x2/2 max pool: pooled (a, b, c) -> row slot 2a, lane 12b + c -----
    y = jnp.maximum(y, _shift_up(y, 1, 0))
    y = jnp.maximum(y, _shift_up(y, C1, 1))
    y = y.astype(jnp.bfloat16)

    # ---- conv2 + bias + ReLU (pooled rows sit at row-slot stride 2) --------
    acc = jnp.dot(y, b2m_ref[0], preferred_element_type=jnp.float32)
    for kh in range(1, K):
        acc = acc + jnp.dot(_shift_up(y, 2 * kh, 0), b2m_ref[kh],
                            preferred_element_type=jnp.float32)
    z = jnp.maximum(acc + b2v_ref[...], 0.0)
    # ---- pool2: pooled (a2, b2, c2) -> row slot 4*a2, lane 32*b2 + c2 ------
    z = jnp.maximum(z, _shift_up(z, 2, 0))
    z = jnp.maximum(z, _shift_up(z, C2, 1))
    z = z.astype(jnp.bfloat16)

    # ---- fc1 + bias + ReLU: accumulate the 5 pooled rows of each image -----
    acc = jnp.dot(z, f1m_ref[0], preferred_element_type=jnp.float32)
    for a2 in range(1, P2):
        acc = acc + jnp.dot(_shift_up(z, 4 * a2, 0), f1m_ref[a2],
                            preferred_element_type=jnp.float32)
    h = jnp.maximum(acc + f1v_ref[...], 0.0).astype(jnp.bfloat16)

    # ---- compact to one row per image (0/1 selection matmul), fc2, fc3 -----
    col = jax.lax.broadcasted_iota(jnp.int32, (nb, rows), 1)
    img = jax.lax.broadcasted_iota(jnp.int32, (nb, rows), 0)
    sel = jnp.where(col == img * IMG, 1.0, 0.0).astype(jnp.bfloat16)
    h = jnp.dot(sel, h, preferred_element_type=jnp.float32).astype(jnp.bfloat16)

    h = jnp.dot(h, w2_ref[...], preferred_element_type=jnp.float32)
    h = jnp.maximum(h + v2_ref[...], 0.0).astype(jnp.bfloat16)
    logits = jnp.dot(h, w3_ref[...], preferred_element_type=jnp.float32)
    logits = logits + v3_ref[...]
    o_ref[...] = logits.reshape(o_ref.shape)


# ---------------------------------------------------------------------------
# Band ("Toeplitz") weight matrices + lane-padded biases, built once in XLA.
# ---------------------------------------------------------------------------
def _build_operands(params, cin, ncls, dtype=jnp.bfloat16):
    w1, b1 = params["conv1_w"], params["conv1_b"]
    w2, b2 = params["conv2_w"], params["conv2_b"]
    f1w, f1b = params["fc1_w"], params["fc1_b"]
    f2w, f2b = params["fc2_w"], params["fc2_b"]
    f3w, f3b = params["fc3_w"], params["fc3_b"]

    # conv1: input lane (j+kw)*cin + ci  ->  output lane j*6 + co
    kh, co, ci, kw, j = np.meshgrid(np.arange(K), np.arange(C1), np.arange(cin),
                                    np.arange(K), np.arange(H1), indexing="ij")
    b1m = jnp.zeros((K, LANE, 2 * LANE), jnp.float32)
    b1m = b1m.at[kh, (j + kw) * cin + ci, j * C1 + co].set(w1[co, ci, kh, kw])
    jj, cc = np.meshgrid(np.arange(H1), np.arange(C1), indexing="ij")
    b1v = jnp.zeros((1, 2 * LANE), jnp.float32).at[0, jj * C1 + cc].set(b1[cc])

    # conv2: pooled lane 12*(j2+kw2) + ci  ->  output lane 16*j2 + co2
    kh, co, ci, kw, j = np.meshgrid(np.arange(K), np.arange(C2), np.arange(C1),
                                    np.arange(K), np.arange(H2), indexing="ij")
    b2m = jnp.zeros((K, 2 * LANE, 2 * LANE), jnp.float32)
    b2m = b2m.at[kh, 2 * C1 * (j + kw) + ci, C2 * j + co].set(w2[co, ci, kh, kw])
    jj, cc = np.meshgrid(np.arange(H2), np.arange(C2), indexing="ij")
    b2v = jnp.zeros((1, 2 * LANE), jnp.float32).at[0, C2 * jj + cc].set(b2[cc])

    # fc1: torch's x.view(-1, 16*5*5) flattens NCHW -> f = c2*25 + a2*5 + b2.
    a2, bb, c2, hh = np.meshgrid(np.arange(P2), np.arange(P2), np.arange(C2),
                                 np.arange(FC1), indexing="ij")
    f1m = jnp.zeros((P2, 2 * LANE, LANE), jnp.float32)
    f1m = f1m.at[a2, 2 * C2 * bb + c2, hh].set(
        f1w[hh, c2 * (P2 * P2) + a2 * P2 + bb])
    f1v = jnp.zeros((1, LANE), jnp.float32).at[0, :FC1].set(f1b)

    w2m = jnp.zeros((LANE, LANE), jnp.float32).at[:FC1, :FC2].set(f2w.T)
    v2 = jnp.zeros((1, LANE), jnp.float32).at[0, :FC2].set(f2b)
    w3m = jnp.zeros((LANE, LANE), jnp.float32).at[:FC2, :ncls].set(f3w.T)
    v3 = jnp.zeros((1, LANE), jnp.float32).at[0, :ncls].set(f3b)

    cast = lambda a: a.astype(dtype)
    return (cast(b1m), b1v, cast(b2m), b2v, cast(f1m), f1v,
            cast(w2m), v2, cast(w3m), v3)


def _pick_batch_tile(n, target=32):
    """Images per grid step: ~10 MiB VMEM at 32; shrink at small batch so the
    'parallel' grid has >= 2 steps (both v7x TensorCores get work)."""
    if n >= 2 * target:
        return target
    return max(1, (n + 1) // 2)


# ---------------------------------------------------------------------------
# Forward pass (mirrors CNNCifar.forward)
# ---------------------------------------------------------------------------
def cnn_cifar_forward(x_nchw, params):
    n, cin = x_nchw.shape[0], x_nchw.shape[1]
    assert x_nchw.shape[2] == IMG and x_nchw.shape[3] == IMG, \
        "CNNCifar's fc1 hard-codes 16*5*5, so inputs must be 32x32"
    assert cin == params["conv1_w"].shape[1] and cin * IMG <= LANE
    ncls = params["fc3_w"].shape[0]
    assert ncls <= LANE

    nb = _pick_batch_tile(n)
    npad = _round_up(n, nb)
    steps = npad // nb

    # Raw image rows (row-major (w, ci) in lanes); only batch/lane zero-pad.
    xr = jnp.transpose(x_nchw, (0, 2, 3, 1)).reshape(n, IMG, IMG * cin)
    xr = jnp.pad(xr, ((0, npad - n), (0, 0), (0, LANE - IMG * cin)))
    xr = xr.astype(jnp.float32)

    ops = _build_operands(params, cin, ncls)

    rows_total = npad * IMG
    flops = (2 * rows_total * LANE * 2 * LANE * K           # conv1
             + 2 * rows_total * 2 * LANE * 2 * LANE * K     # conv2
             + 2 * rows_total * 2 * LANE * LANE * P2        # fc1
             + 2 * npad * nb * IMG * LANE                   # row selection
             + 2 * 2 * npad * LANE * LANE)                  # fc2 + fc3
    bytes_accessed = (xr.size * 4 + npad * LANE * 4
                      + sum(int(o.size) * o.dtype.itemsize for o in ops))

    def resident(shape):
        nd = len(shape)
        return pl.BlockSpec(shape, lambda i: (0,) * nd)

    out = pl.pallas_call(
        _lenet_kernel,
        out_shape=jax.ShapeDtypeStruct((steps, nb, LANE), jnp.float32),
        grid=(steps,),
        in_specs=[pl.BlockSpec((nb, IMG, LANE), lambda i: (i, 0, 0))]
                + [resident(op.shape) for op in ops],
        out_specs=pl.BlockSpec((1, nb, LANE), lambda i: (i, 0, 0)),
        compiler_params=pltpu.CompilerParams(
            dimension_semantics=("parallel",),
            vmem_limit_bytes=32 * 1024 * 1024),
        cost_estimate=pl.CostEstimate(flops=int(flops), transcendentals=0,
                                      bytes_accessed=int(bytes_accessed)),
    )(xr, *ops)
    return out.reshape(npad, LANE)[:n, :ncls]


# ---------------------------------------------------------------------------
# Parameters (deterministic, PyTorch-like uniform(-1/sqrt(fan_in), +) init)
# ---------------------------------------------------------------------------
def init_params(key, input_channels=3, output_channels=10):
    ks = jax.random.split(key, 10)

    def u(k, shape, fan_in):
        bound = 1.0 / np.sqrt(float(fan_in))
        return jax.random.uniform(k, shape, jnp.float32, -bound, bound)

    p = {}
    p["conv1_w"] = u(ks[0], (C1, input_channels, K, K), input_channels * K * K)
    p["conv1_b"] = u(ks[1], (C1,), input_channels * K * K)
    p["conv2_w"] = u(ks[2], (C2, C1, K, K), C1 * K * K)
    p["conv2_b"] = u(ks[3], (C2,), C1 * K * K)
    p["fc1_w"] = u(ks[4], (FC1, C2 * P2 * P2), C2 * P2 * P2)
    p["fc1_b"] = u(ks[5], (FC1,), C2 * P2 * P2)
    p["fc2_w"] = u(ks[6], (FC2, FC1), FC1)
    p["fc2_b"] = u(ks[7], (FC2,), FC1)
    p["fc3_w"] = u(ks[8], (output_channels, FC2), FC2)
    p["fc3_b"] = u(ks[9], (output_channels,), FC2)
    return p


def _reference_forward(x, params):
    """Pure-JAX float32 reference of CNNCifar.forward (for validation)."""
    def conv(v, w, b):
        y = jax.lax.conv_general_dilated(
            v, w, (1, 1), "VALID", dimension_numbers=("NCHW", "OIHW", "NCHW"))
        return y + b[None, :, None, None]

    def pool(v):
        return jax.lax.reduce_window(v, -jnp.inf, jax.lax.max,
                                     (1, 1, 2, 2), (1, 1, 2, 2), "VALID")

    y = pool(jax.nn.relu(conv(x, params["conv1_w"], params["conv1_b"])))
    y = pool(jax.nn.relu(conv(y, params["conv2_w"], params["conv2_b"])))
    y = y.reshape(y.shape[0], -1)          # NCHW flatten == torch .view
    y = jax.nn.relu(y @ params["fc1_w"].T + params["fc1_b"])
    y = jax.nn.relu(y @ params["fc2_w"].T + params["fc2_b"])
    return y @ params["fc3_w"].T + params["fc3_b"]


# ---------------------------------------------------------------------------
# Main
# ---------------------------------------------------------------------------
if __name__ == "__main__":
    _detect_roll_sign()            # one tiny probe kernel, outside any jit

    key = jax.random.PRNGKey(0)
    k_param, k_x = jax.random.split(key)
    params = init_params(k_param, input_channels=3, output_channels=10)
    # CIFAR-shaped input (fc1 hard-codes 16*5*5, so spatial must be 32x32).
    x = jax.random.normal(k_x, (2, 3, 32, 32), dtype=jnp.float32)

    fwd = jax.jit(cnn_cifar_forward)
    out = jax.block_until_ready(fwd(x, params))

    assert out.shape == (2, 10), out.shape
    assert out.dtype == jnp.float32
    assert bool(jnp.all(jnp.isfinite(out)))

    ref = _reference_forward(x, params)
    tol = 0.1 + 0.1 * float(jnp.max(jnp.abs(ref)))       # bf16-matmul slack
    err = float(jnp.max(jnp.abs(out - ref)))
    assert err < tol, f"kernel/reference mismatch: max|diff|={err} (tol {tol})"

    print("KERNEL_OK")
</pallas_src>

<mosaic_0001>
module attributes {stable_mosaic.version = 11 : i64} {
  func.func @kernel(%arg0: memref<8x128xf32, #tpu.memory_space<vmem>>, %arg1: memref<8x128xf32, #tpu.memory_space<vmem>>) attributes {dimension_semantics = [], scalar_prefetch = 0 : i64, scratch_operands = 0 : i64, tpu.core_type = #tpu.core_type<tc>} {
    %c0 = arith.constant 0 : index
    %c0_0 = arith.constant 0 : index
    %0 = vector.load %arg0[%c0, %c0_0] : memref<8x128xf32, #tpu.memory_space<vmem>>, vector<8x128xf32>
    %c1_i32 = arith.constant 1 : i32
    %1 = tpu.dynamic_rotate %0 by %c1_i32 dim 0 : vector<8x128xf32>, i32 -> vector<8x128xf32>
    %c0_1 = arith.constant 0 : index
    %c0_2 = arith.constant 0 : index
    %2 = vector.load %arg1[%c0_1, %c0_2] : memref<8x128xf32, #tpu.memory_space<vmem>>, vector<8x128xf32>
    tpu.vector_store %arg1[%c0_1, %c0_2], %1 {strides = array<i32>} : memref<8x128xf32, #tpu.memory_space<vmem>>, vector<8x128xf32>,
    return
  }
}

</mosaic_0001>

<bundles_post_ra>
// kernel: tpu_custom_call.1
= control target key start
LH: loop header
LB: loop body
LE: loop exit
PB: predicated region body
PF: predicated region fallthrough
CT: control target
= control target key end

     0   :  { %6 = vsyncpa [#allocation3], 0  ;;  %s125_s0 = inlined_call_operand.hbm [shape: f32[8,128], index: 0, kind: input, shape index: {}]   ;;  %s126_s1 = inlined_call_operand.hbm [shape: f32[8,128], index: 1, kind: output, shape index: {}]  }
   0x1   :  { %7 = vsyncpa [#allocation4], 0  ;;  %s89_s6 = smov [#allocation2]   ;;  %s41_s10 = scalar_lea.hbm %s125_s0, 128 }
   0x2   :  { %s14_s7 = sshll.u32 %s89_s6, 4  ;;  %p42_p0 = scmp.ne.s32.totalorder %s125_s0, %s41_s10  ;;  %s15_s7 = int_to_ptr.vmem [resolvable:$true] %s14_s7 }
   0x3   :  { %p45_p1 = scmp.lt.u32.totalorder %s41_s10, %s125_s0 }
   0x5   :  { %p47_p2 = pnand %p45_p1, %p42_p0 }
   0x7   :  { %50 = shalt.err (!%p47_p2)
}
   0x8   :  { %s51_s15 = scalar_lea.vmem %s15_s7, 128  ;;  %p56_p4 = scmp.lt.s32.totalorder %s15_s7, %s15_s7 }
   0x9   :  { %p52_p3 = scmp.ne.s32.totalorder %s15_s7, %s51_s15  ;;  %p57_p5 = scmp.lt.s32.totalorder %s51_s15, %s51_s15 }
   0xb   :  { %p58_p6 = por %p57_p5, %p56_p4 }
   0xd   :  { %p59_p7 = pnand %p58_p6, %p52_p3 }
   0xf   :  { %62 = shalt.err (!%p59_p7)
}
  0x10   :  { %17 = dma.hbm_to_vmem [thread:$0]  %s125_s0, 128, %s15_s7, [#allocation3]  }
  0x11   :  { %85 = dma.done.wait [#allocation3], 128  }
  0x12   :  { %86 = vsyncadd [#allocation3], 4294967168  ;;  %s90_s18 = smov [#allocation5]   ;;  %v21_v0 = vld [vmem:[#allocation2] sm:$0xff] }
  0x13   :  { %s30_s19 = sshll.u32 %s90_s18, 4  ;;  %v22_v1 = vrot.slane %v21_v0, 7  ;;  %s31_s19 = int_to_ptr.vmem [resolvable:$true] %s30_s19 }
  0x14   :  { %s63_s20 = scalar_lea.vmem %s31_s19, 128  ;;  %p68_p9 = scmp.lt.s32.totalorder %s31_s19, %s31_s19 }
  0x15   :  { %23 = vst [vmem:[#allocation5] sm:$0xff] %v22_v1  ;;  %p64_p8 = scmp.ne.s32.totalorder %s31_s19, %s63_s20  ;;  %p69_p10 = scmp.lt.s32.totalorder %s63_s20, %s63_s20 }
  0x17   :  { %p70_p11 = por %p69_p10, %p68_p9 }
  0x19   :  { %p71_p12 = pnand %p70_p11, %p64_p8 }
  0x1b   :  { %74 = shalt.err (!%p71_p12)
}
  0x1c   :  { %s75_s23 = scalar_lea.hbm %s126_s1, 128 }
  0x1d   :  { %p76_p13 = scmp.ne.s32.totalorder %s126_s1, %s75_s23  ;;  %p79_p0 = scmp.lt.u32.totalorder %s75_s23, %s126_s1 }
  0x1f   :  { %p81_p1 = pnand %p79_p0, %p76_p13 }
  0x21   :  { %84 = shalt.err (!%p81_p1)
}
  0x22   :  { %33 = dma.vmem_to_hbm [thread:$0]  %s31_s19, 128, %s126_s1, [#allocation4]  }
  0x23   :  { %87 = dma.done.wait [#allocation4], 128  }
  0x24   :  { %88 = vsyncadd [#allocation4], 4294967168 }
  0x25   :  { %37 = vsyncpa [#allocation3], 1 }
  0x26   :  { %38 = vsyncpa [#allocation4], 1 }

</bundles_post_ra>
